<compile_context>
chip_gen: v7x
topology: tpu7x:2x2x1
jax: 0.10.0
libtpu: 0.0.40
codegen_flags: <defaults>
</compile_context>

<pallas_src>
from typing import NamedTuple

import jax
import jax.numpy as jnp
from jax.experimental import pallas as pl
from jax.experimental.pallas import tpu as pltpu


def _round_up(x, m):
    return ((x + m - 1) // m) * m


# ---------------------------------------------------------------------------
# Kernels
# ---------------------------------------------------------------------------

def _linear_onepass_kernel(x_ref, w_ref, b_ref, o_ref):
    """Full reduction in one MXU pass: o = (x @ w + b).astype(out)."""
    o_ref[...] = (
        jnp.dot(x_ref[...], w_ref[...], preferred_element_type=jnp.float32)
        + b_ref[...]
    ).astype(o_ref.dtype)


def _linear_acc_kernel(x_ref, w_ref, b_ref, o_ref, acc_ref):
    """(M,N,K)-tiled matmul; f32 accumulator resident across K; bias folded
    into the k==0 init so the epilogue is a pure cast + store."""
    k = pl.program_id(2)

    @pl.when(k == 0)
    def _init():
        acc_ref[...] = jnp.broadcast_to(b_ref[...], acc_ref.shape).astype(jnp.float32)

    acc_ref[...] += jnp.dot(x_ref[...], w_ref[...],
                            preferred_element_type=jnp.float32)

    @pl.when(k == pl.num_programs(2) - 1)
    def _finalize():
        o_ref[...] = acc_ref[...].astype(o_ref.dtype)


# ---------------------------------------------------------------------------
# Parameter preparation (one-time, hoisted out of the forward path)
# ---------------------------------------------------------------------------

class LinearParams(NamedTuple):
    w_t: jax.Array      # (Dp, Cp)  pre-transposed, padded, compute dtype
    bias2d: jax.Array   # (1, Cp)   float32, padded
    D: int
    C: int
    Dp: int
    Cp: int
    tn: int
    tk: int
    compute_dtype: object


def prepare_linear_params(weight, bias, *, compute_dtype=jnp.bfloat16,
                          tile_n=512, tile_k=1024):
    """One-time relayout of nn.Linear params: (C,D) -> padded (Dp,Cp) W^T."""
    C, D = weight.shape
    assert bias.shape == (C,)
    tn = min(tile_n, _round_up(C, 128))
    tk = min(tile_k, _round_up(D, 128))
    Dp = _round_up(D, tk)
    Cp = _round_up(C, tn)

    w_t = weight.T.astype(compute_dtype)
    if (Dp, Cp) != (D, C):
        w_t = jnp.pad(w_t, ((0, Dp - D), (0, Cp - C)))
    bias2d = bias.reshape(1, C).astype(jnp.float32)
    if Cp != C:
        bias2d = jnp.pad(bias2d, ((0, 0), (0, Cp - C)))
    return LinearParams(w_t=w_t, bias2d=bias2d, D=D, C=C, Dp=Dp, Cp=Cp,
                        tn=tn, tk=tk, compute_dtype=compute_dtype)


# ---------------------------------------------------------------------------
# Forward
# ---------------------------------------------------------------------------

def logistic_regression_forward(x, params: LinearParams, *, tile_m=None,
                                max_resident_weight_bytes=8 << 20,
                                min_flops_for_pallas=1 << 22):
    """y = x @ W^T + b  (matches torch.nn.Linear forward)."""
    B, D = x.shape
    assert D == params.D, "input feature dim mismatch with prepared params"
    C, Dp, Cp, tn, tk = params.C, params.Dp, params.Cp, params.tn, params.tk
    out_dtype = x.dtype
    cdt = params.compute_dtype
    itemsize = jnp.dtype(cdt).itemsize
    out_itemsize = jnp.dtype(out_dtype).itemsize

    flops = 2 * B * D * C
    if flops < min_flops_for_pallas:
        # Tiny problem: pallas_call overhead + (8,128) tile padding dwarf the
        # ~KFLOPs of work; let XLA fuse a plain matmul instead.
        y = jnp.dot(x.astype(cdt), params.w_t[:D, :C],
                    preferred_element_type=jnp.float32)
        return (y + params.bias2d[:, :C]).astype(out_dtype)

    # M tiling: 256-aligned for the 256-wide v6e/v7x MXU when B is large, but
    # keep >= 2 row blocks whenever possible so v7x's 2 TensorCores both work.
    tm = (256 if B >= 256 else 128) if tile_m is None else tile_m
    tm = min(tm, _round_up(B, 8))
    Bp = _round_up(B, tm)
    if tile_m is None and Bp // tm < 2 and tm > 128 and B > 128:
        tm = 128
        Bp = _round_up(B, tm)

    x = x.astype(cdt)
    if (Bp, Dp) != (B, D):
        x = jnp.pad(x, ((0, Bp - B), (0, Dp - D)))  # zeros: K-reduction neutral

    cost = pl.CostEstimate(
        flops=flops,
        transcendentals=0,
        bytes_accessed=(Bp * Dp * itemsize + Dp * Cp * itemsize
                        + Bp * Cp * out_itemsize + Cp * 4),
    )

    w_bytes = Dp * Cp * itemsize
    resident_vmem_est = (w_bytes + 2 * tm * Dp * itemsize
                         + 2 * tm * Cp * out_itemsize + tm * Cp * 4 + Cp * 4)
    use_resident = (w_bytes <= max_resident_weight_bytes
                    and resident_vmem_est <= 12 * 1024 * 1024)

    if use_resident:
        # W^T and bias DMA'd once (block index never changes) and kept resident
        # in VMEM across all batch row-blocks.
        out = pl.pallas_call(
            _linear_onepass_kernel,
            out_shape=jax.ShapeDtypeStruct((Bp, Cp), out_dtype),
            grid=(Bp // tm,),
            in_specs=[
                pl.BlockSpec((tm, Dp), lambda i: (i, 0)),    # x row-block
                pl.BlockSpec((Dp, Cp), lambda i: (0, 0)),    # resident W^T
                pl.BlockSpec((1, Cp), lambda i: (0, 0)),     # resident bias
            ],
            out_specs=pl.BlockSpec((tm, Cp), lambda i: (i, 0)),
            compiler_params=pltpu.CompilerParams(
                dimension_semantics=("parallel",)),
            cost_estimate=cost,
        )(x, params.w_t, params.bias2d)
    elif Dp == tk:
        # Single K tile: no accumulator scratch, no k grid axis.
        out = pl.pallas_call(
            _linear_onepass_kernel,
            out_shape=jax.ShapeDtypeStruct((Bp, Cp), out_dtype),
            grid=(Bp // tm, Cp // tn),
            in_specs=[
                pl.BlockSpec((tm, Dp), lambda i, j: (i, 0)),
                pl.BlockSpec((Dp, tn), lambda i, j: (0, j)),
                pl.BlockSpec((1, tn), lambda i, j: (0, j)),
            ],
            out_specs=pl.BlockSpec((tm, tn), lambda i, j: (i, j)),
            compiler_params=pltpu.CompilerParams(
                dimension_semantics=("parallel", "parallel")),
            cost_estimate=cost,
        )(x, params.w_t, params.bias2d)
    else:
        # General (M, N, K) tiling; reduction axis last, f32 VMEM accumulator.
        out = pl.pallas_call(
            _linear_acc_kernel,
            out_shape=jax.ShapeDtypeStruct((Bp, Cp), out_dtype),
            grid=(Bp // tm, Cp // tn, Dp // tk),
            in_specs=[
                pl.BlockSpec((tm, tk), lambda i, j, k: (i, k)),
                pl.BlockSpec((tk, tn), lambda i, j, k: (k, j)),
                pl.BlockSpec((1, tn), lambda i, j, k: (0, j)),
            ],
            out_specs=pl.BlockSpec((tm, tn), lambda i, j, k: (i, j)),
            scratch_shapes=[pltpu.VMEM((tm, tn), jnp.float32)],
            compiler_params=pltpu.CompilerParams(
                dimension_semantics=("parallel", "parallel", "arbitrary")),
            cost_estimate=cost,
        )(x, params.w_t, params.bias2d)

    if (Bp, Cp) != (B, C):
        out = out[:B, :C]
    return out


# ---------------------------------------------------------------------------
# Self-test
# ---------------------------------------------------------------------------

if __name__ == "__main__":
    key = jax.random.PRNGKey(0)
    kx, kw, kb, kx2, kw2, kb2 = jax.random.split(key, 6)

    # 1) Deployed module shape: batch=8, input_size=32, num_classes=16
    batch, input_size, num_classes = 8, 32, 16
    bound = 1.0 / jnp.sqrt(jnp.float32(input_size))
    weight = jax.random.uniform(kw, (num_classes, input_size), jnp.float32,
                                minval=-bound, maxval=bound)
    bias = jax.random.uniform(kb, (num_classes,), jnp.float32,
                              minval=-bound, maxval=bound)
    x = jax.random.normal(kx, (batch, input_size), jnp.float32)

    params_f32 = prepare_linear_params(weight, bias, compute_dtype=jnp.float32)
    y = jax.block_until_ready(logistic_regression_forward(x, params_f32))
    y_ref = x @ weight.T + bias
    assert y.shape == (batch, num_classes)
    assert jnp.allclose(y, y_ref, atol=1e-5, rtol=1e-5)

    # 2) Larger (still small) problem that actually dispatches the Pallas paths
    B2, D2, C2 = 256, 384, 256
    bound2 = 1.0 / jnp.sqrt(jnp.float32(D2))
    w2 = jax.random.uniform(kw2, (C2, D2), jnp.float32,
                            minval=-bound2, maxval=bound2)
    b2 = jax.random.uniform(kb2, (C2,), jnp.float32,
                            minval=-bound2, maxval=bound2)
    x2 = jax.random.normal(kx2, (B2, D2), jnp.float32)
    ref2 = x2 @ w2.T + b2

    # 2a) f32 compute, resident-weight path (tight tolerance)
    p_f32 = prepare_linear_params(w2, b2, compute_dtype=jnp.float32)
    y_f32 = jax.block_until_ready(logistic_regression_forward(x2, p_f32))
    assert jnp.allclose(y_f32, ref2, atol=1e-4, rtol=1e-4)

    # 2b) bf16 compute (default), resident-weight path
    p_bf16 = prepare_linear_params(w2, b2)
    y_res = jax.block_until_ready(logistic_regression_forward(x2, p_bf16))
    assert jnp.allclose(y_res, ref2, atol=6e-2, rtol=5e-2)

    # 2c) bf16, single-K tiled path (force non-resident)
    y_1k = jax.block_until_ready(
        logistic_regression_forward(x2, p_bf16, max_resident_weight_bytes=0))
    assert jnp.allclose(y_1k, ref2, atol=6e-2, rtol=5e-2)

    # 2d) bf16, multi-K accumulator path (small K/N tiles, non-resident)
    p_small = prepare_linear_params(w2, b2, tile_n=128, tile_k=128)
    y_acc = jax.block_until_ready(
        logistic_regression_forward(x2, p_small, max_resident_weight_bytes=0))
    assert jnp.allclose(y_acc, ref2, atol=6e-2, rtol=5e-2)

    print("KERNEL_OK")
</pallas_src>

<mosaic_0001>
module attributes {stable_mosaic.version = 11 : i64} {
  func.func @_linear_onepass_kernel(%arg0: i32, %arg1: memref<128x384xf32, #tpu.memory_space<vmem>>, %arg2: memref<384x256xf32, #tpu.memory_space<vmem>>, %arg3: memref<1x256xf32, #tpu.memory_space<vmem>>, %arg4: memref<128x256xf32, #tpu.memory_space<vmem>>) attributes {dimension_semantics = [#tpu.dimension_semantics<parallel>], iteration_bounds = array<i64: 2>, scalar_prefetch = 0 : i64, scratch_operands = 0 : i64, tpu.core_type = #tpu.core_type<tc>, window_params = [{transform_indices = @transform_0, window_bounds = array<i64: 128, 384>}, {pipeline_mode = #tpu.pipeline_mode<synchronous>, transform_indices = @transform_1, window_bounds = array<i64: 384, 256>}, {pipeline_mode = #tpu.pipeline_mode<synchronous>, transform_indices = @transform_2, window_bounds = array<i64: 1, 256>}, {transform_indices = @transform_3, window_bounds = array<i64: 128, 256>}]} {
    %c0 = arith.constant 0 : index
    %c0_0 = arith.constant 0 : index
    %0 = vector.load %arg1[%c0, %c0_0] : memref<128x384xf32, #tpu.memory_space<vmem>>, vector<128x384xf32>
    %c0_1 = arith.constant 0 : index
    %c0_2 = arith.constant 0 : index
    %1 = vector.load %arg2[%c0_1, %c0_2] : memref<384x256xf32, #tpu.memory_space<vmem>>, vector<384x256xf32>
    %cst = arith.constant dense<0.000000e+00> : vector<128x256xf32>
    %2 = tpu.matmul %0, %1, %cst {dimension_numbers = #tpu.dot_dimension_numbers<[1], [0], [0], [1], [0, 0, 1, 1], [], []>} : vector<128x384xf32>, vector<384x256xf32>, vector<128x256xf32> -> vector<128x256xf32>
    %c0_3 = arith.constant 0 : index
    %c0_4 = arith.constant 0 : index
    %3 = vector.load %arg3[%c0_3, %c0_4] : memref<1x256xf32, #tpu.memory_space<vmem>>, vector<1x256xf32>
    %4 = vector.broadcast %3 : vector<1x256xf32> to vector<128x256xf32>
    %5 = arith.addf %2, %4 : vector<128x256xf32>
    %c0_5 = arith.constant 0 : index
    %c0_6 = arith.constant 0 : index
    %6 = vector.load %arg4[%c0_5, %c0_6] : memref<128x256xf32, #tpu.memory_space<vmem>>, vector<128x256xf32>
    tpu.vector_store %arg4[%c0_5, %c0_6], %5 {strides = array<i32>} : memref<128x256xf32, #tpu.memory_space<vmem>>, vector<128x256xf32>,
    return
  }
  func.func @transform_0(%arg0: i32) -> (i32, i32) {
    %c0_i32 = arith.constant 0 : i32
    %c0_i32_0 = arith.constant 0 : i32
    return %arg0, %c0_i32 : i32, i32
  }
  func.func @transform_1(%arg0: i32) -> (i32, i32) {
    %c0_i32 = arith.constant 0 : i32
    %c0_i32_0 = arith.constant 0 : i32
    %c0_i32_1 = arith.constant 0 : i32
    return %c0_i32, %c0_i32_0 : i32, i32
  }
  func.func @transform_2(%arg0: i32) -> (i32, i32) {
    %c0_i32 = arith.constant 0 : i32
    %c0_i32_0 = arith.constant 0 : i32
    %c0_i32_1 = arith.constant 0 : i32
    return %c0_i32, %c0_i32_0 : i32, i32
  }
  func.func @transform_3(%arg0: i32) -> (i32, i32) {
    %c0_i32 = arith.constant 0 : i32
    %c0_i32_0 = arith.constant 0 : i32
    return %arg0, %c0_i32 : i32, i32
  }
}

</mosaic_0001>

<bundles_post_ra>
// kernel: tpu_custom_call.1
= control target key start
LH: loop header
LB: loop body
LE: loop exit
PB: predicated region body
PF: predicated region fallthrough
CT: control target
= control target key end

     0   :  { %8 = vsyncpa [#allocation3], 0  ;;  %s1562_s0 = inlined_call_operand.hbm [shape: f32[256,384], index: 0, kind: input, shape index: {}]   ;;  %s1563_s1 = inlined_call_operand.hbm [shape: f32[384,256], index: 1, kind: input, shape index: {}]   ;;  %s1564_s2 = inlined_call_operand.vmem [shape: f32[1,256], index: 2, kind: input, shape index: {}]   ;;  %s1565_s3 = inlined_call_operand.hbm [shape: f32[256,256], index: 3, kind: output, shape index: {}]  }
   0x1   :  { %10 = vsyncpa [#allocation3 + $0x1], 0 }
   0x2   :  { %11 = vsyncpa [#allocation6], 0 }
   0x3   :  { %12 = vsyncpa [#allocation4], 0 }
   0x4   :  { %14 = vsyncpa [#allocation4 + $0x1], 0  ;;  %s1220_s12 = smov 0   ;;  %s1222_s13 = smov 0  }
   0x5   :  { %s1224_s14 = smov 0   ;;  %s1226_s15 = smov 0  }
   0x6 LB: > { %s1241_s16 = sadd.s32 4294967295, %s1188_s15   ;;  %s815_s17 = sadd.s32 4294967294, %s1188_s15   ;;  %s1188_s15 = sphi %s1226_s15, %s1585_s15   ;;  %s1184_s14 = sphi %s1224_s14, %s1584_s14   ;;  %s1180_s13 = sphi %s1222_s13, %s1583_s13   ;;  %s1176_s12 = sphi %s1220_s12, %s1582_s12  }
   0x7   : > { %p40_p0 = scmp.ne.s32.totalorder %s1180_s13, %s1176_s12  ;;  %p1566_p1 = scmp.eq.s32.totalorder %s1241_s16, 0 }
   0x8   : > { %p112_p3 = scmp.eq.s32.totalorder %s815_s17, 1  ;;  %p816_p5 = scmp.ge.s32.totalorder %s1188_s15, 1 }
   0x9   : > { %p1250_p4 = por %p1566_p1, %p40_p0  ;;  %p119_p7 = scmp.lt.s32.totalorder %s1188_s15, 3 }
   0xa   : > { %p1255_p6 = por %p112_p3, %p40_p0  ;;  %s1190_s21 = smov [#allocation5]  }
   0xb   : > { %s1569_s18 = scalar_select %p1250_p4, 1, 0 }
   0xc   : > { %s1570_s19 = scalar_select %p1255_p6, 1, 0 }
   0xd   : > { %p1260_p8 = pnand %p816_p5, %p119_p7  ;;  %s131_s22 = sshll.u32 %s1190_s21, 4  ;;  %s1264_s22 = int_to_ptr.vmem [resolvable:$true] %s131_s22 }
   0xe   : > { %s1276_s24 = sadd.s32 1, %s1188_s15   ;;  %s27_s25 = sadd.s32 1, %s1184_s14 }
   0xf   : > { %s1571_s20 = scalar_select %p1260_p8, 1, 0 }
  0x10   : > { %p1004_p9 = pneg %p1260_p8  ;;  %s24_s26 = ssub.s32 %s1188_s15, %s1276_s24 }
  0x11   : > { %s1060_s29 = scalar_lea.hbm %s1563_s1, 12288 }
  0x12   : > { %p1271_p11 = pnand %p1004_p9, %p1566_p1  ;;  %p1061_p12 = scmp.ne.s32.totalorder %s1563_s1, %s1060_s29 }
  0x13   : > { %p1067_p5 = scmp.lt.u32.totalorder %s1060_s29, %s1563_s1 }
  0x14   : > { %p1062_p13 = pneg %p1271_p11 }
  0x16   : > { %p1063_p0 = pnand %p1062_p13, %p1061_p12 }
  0x18   : > { %p1064_p3 = pneg %p1063_p0 }
  0x1a   : > { %p1069_p7 = pnand %p1067_p5, %p1064_p3 }
  0x1c   : > { %1072 = shalt.err (!%p1069_p7)
}
  0x1d   : > { %s1073_s7 = scalar_lea.vmem %s1264_s22, 12288  ;;  %p1081_p2 = scmp.lt.s32.totalorder %s1264_s22, %s1264_s22 }
  0x1e   : > { %p1074_p9 = scmp.ne.s32.totalorder %s1264_s22, %s1073_s7  ;;  %p1082_p6 = scmp.lt.s32.totalorder %s1073_s7, %s1073_s7 }
  0x20   : > { %p1076_p10 = pnand %p1074_p9, %p1062_p13  ;;  %p1083_p4 = por %p1082_p6, %p1081_p2 }
  0x22   : > { %p1077_p1 = pneg %p1076_p10 }
  0x24   : > { %p1084_p8 = pnand %p1083_p4, %p1077_p1 }
  0x26   : > { %1087 = shalt.err (!%p1084_p8)
}
  0x27   : > { %s1191_s8 = smov 256   ;;  %s1192_s9 = smov 16  }
  0x28   : > { %1007 = dma.hbm_to_vmem [thread:$0]  (!%p1271_p11), %s1563_s1, 12288, %s1264_s22, [#allocation6], %s1191_s8, %s1191_s8, %s1192_s9  }
  0x29   : > { %p25_p2 = scmp.eq.s32.totalorder %s24_s26, 0  ;;  %p34_p1 = scmp.ne.s32.totalorder %s1184_s14, %s1180_s13 }
  0x2a   : > { %p35_p4 = scmp.eq.s32.totalorder %s1188_s15, 0  ;;  %p1017_p6 = scmp.lt.s32.totalorder %s1188_s15, 2 }
  0x2b   : > { %s1307_s17 = scalar_select %p25_p2, %s1184_s14, %s27_s25  }
  0x2c   : > { %p36_p8 = por %p35_p4, %p34_p1  ;;  %p1573_p10 = scmp.eq.s32.totalorder %s1241_s16, 1 }
  0x2d   : > { %s148_s27 = sand.u32 1, %s1184_s14   ;;  %s994_s28 = smul.u32 6144, %s1188_s15 }
  0x2e   : > { %p1311_p12 = por %p1573_p10, %p34_p1  ;;  %s993_s29 = smul.u32 384, %s148_s27 }
  0x2f   : > { %s1320_s4 = scalar_lea.hbm %s1562_s0, %s994_s28  ;;  %p1322_p11 = pnand %p1017_p6, %p36_p8 }
  0x30   : > { %s152_s25 = scalar_lea.vmem [#allocation2], %s993_s29  ;;  %s1328_s5 = scalar_lea.sflag [#allocation3], %s148_s27 }
  0x31   : > { %s160_s26 = sshll.u32 %s152_s25, 4  ;;  %s1088_s6 = scalar_lea.hbm %s1320_s4, 6144  ;;  %s1326_s26 = int_to_ptr.vmem [resolvable:$true] %s160_s26 }
  0x32   : > { %p1089_p13 = scmp.ne.s32.totalorder %s1320_s4, %s1088_s6  ;;  %p1090_p0 = pneg %p1322_p11 }
  0x33   : > { %s1093_s9 = scalar_lea.hbm %s1562_s0, 12288  ;;  %p1094_p7 = scmp.lt.u32.totalorder %s1320_s4, %s1562_s0 }
  0x34   : > { %p1091_p3 = pnand %p1090_p0, %p1089_p13  ;;  %p1095_p9 = scmp.lt.u32.totalorder %s1093_s9, %s1088_s6 }
  0x35   : > { %p1097_p1 = scmp.lt.u32.totalorder %s1088_s6, %s1320_s4 }
  0x36   : > { %p1092_p5 = pneg %p1091_p3  ;;  %p1096_p2 = por %p1095_p9, %p1094_p7 }
  0x38   : > { %p1098_p4 = por %p1097_p1, %p1096_p2 }
  0x3a   : > { %p1099_p6 = pnand %p1098_p4, %p1092_p5 }
  0x3c   : > { %1102 = shalt.err (!%p1099_p6)
}
  0x3d   : > { %s1103_s27 = scalar_lea.vmem %s1326_s26, 6144  ;;  %s1193_s28 = smov [#allocation2]  }
  0x3e   : > { %p1104_p8 = scmp.ne.s32.totalorder %s1326_s26, %s1103_s27  ;;  %s1108_s29 = sshll.u32 %s1193_s28, 4  ;;  %s1109_s29 = int_to_ptr.vmem [resolvable:$false] %s1108_s29 }
  0x3f   : > { %s1110_s23 = scalar_lea.vmem %s1109_s29, 12288  ;;  %p1111_p3 = scmp.lt.s32.totalorder %s1326_s26, %s1109_s29 }
  0x40   : > { %p1106_p10 = pnand %p1104_p8, %p1090_p0  ;;  %p1112_p7 = scmp.lt.s32.totalorder %s1110_s23, %s1103_s27 }
  0x42   : > { %p1107_p13 = pneg %p1106_p10  ;;  %p1113_p9 = por %p1112_p7, %p1111_p3 }
  0x44   : > { %p1114_p2 = pnand %p1113_p9, %p1107_p13 }
  0x46   : > { %1117 = shalt.err (!%p1114_p2)
}
  0x47   : > { %s1194_s30 = smov 384   ;;  %s1195_s25 = smov 24  }
  0x48   : > { %1011 = dma.hbm_to_vmem [thread:$0]  (!%p1322_p11), %s1320_s4, 6144, %s1326_s26, %s1328_s5, %s1194_s30, %s1194_s30, %s1195_s25  }
  0x49   : > { %p1576_p0 = scmp.ne.s32.totalorder %s1571_s20, 0 }
  0x4a   : > { %s1359_s6 = sand.u32 (!%p1576_p0), 1, %s1180_s13   ;;  %p1577_p5 = scmp.ne.s32.totalorder (!%p1576_p0), %s1569_s18, 0 }
  0x4b   : > { %172 = sbr.rel (%p1576_p0) target bundleno = 445 (0x1bd), region = 32  ;;  %s175_s8 = scalar_lea.sflag (!%p1576_p0), [#allocation3], %s1359_s6 }
  0x4c   : > { %s995_s7 = smul.u32 (!%p1576_p0), 384, %s1359_s6 }
  0x4e   : > { %s1363_s9 = scalar_lea.vmem (!%p1576_p0), [#allocation2], %s995_s7 }
  0x52   : > { %1163 = dma.done.wait (%p1577_p5), %s175_s8, 6144  }
  0x53   : > { %1165 = vsyncadd (%p1577_p5), %s175_s8, 4294961152  ;;  %p1578_p11 = scmp.eq.s32.totalorder %s1241_s16, 0 }
  0x55   : > { %1167 = dma.done.wait (%p1578_p11), [#allocation6], 12288   ;;  %p1579_p1 = pmov %p1578_p11 }
  0x56   : > { %v1196_v0 = vmov 0.0   ;;  %v256_v1 = vld [vmem:[#allocation5 + $0x8] sm:$0xff]  ;;  %v258_v2 = vld [vmem:[#allocation5 + $0x18] sm:$0xff]  ;;  %v255_v3 = vld [vmem:[#allocation5] sm:$0xff]  ;;  %s824_s4 = sshll.u32 %s1359_s6, 8  ;;  %s832_s26 = sshll.u32 %s1241_s16, 12 }
  0x57   : > { %1169 = vsyncadd (%p1579_p1), [#allocation6], 4294955008  ;;  %588 = vmatprep.mubr.f32.mxu0 %v1196_v0  ;;  %v833_v4 = vpack.c.bf16 %v258_v2, %v256_v1  ;;  %v257_v5 = vld [vmem:[#allocation5 + $0x10] sm:$0xff]  ;;  %v260_v6 = vld [vmem:[#allocation5 + $0x28] sm:$0xff]  ;;  %s1447_s22 = scalar_lea.vmem [#allocation7], %s824_s4  ;;  %s1514_s27 = scalar_lea.hbm %s1565_s3, %s832_s26 }
  0x58   : > { %v262_v7 = vld [vmem:[#allocation5 + $0x38] sm:$0xff]  ;;  %v835_v8 = vpack.c.bf16 %v257_v5, %v255_v3  ;;  %v259_v10 = vld [vmem:[#allocation5 + $0x20] sm:$0xff]  ;;  %v261_v11 = vld [vmem:[#allocation5 + $0x30] sm:$0xff]  ;;  %s732_s5 = sshll.u32 %s1447_s22, 4  ;;  %s718_s16 = scalar_lea.sflag [#allocation4], %s1359_s6  ;;  %s1516_s5 = int_to_ptr.vmem [resolvable:$true] %s732_s5 }
  0x59   : > { %v837_v9 = vpack.c.bf16 %v262_v7, %v260_v6  ;;  %v264_v12 = vld [vmem:[#allocation5 + $0x48] sm:$0xff]  ;;  %834 = vmatprep.subr.bf16.mxu1 %v833_v4  ;;  %v266_v13 = vld [vmem:[#allocation5 + $0x58] sm:$0xff]  ;;  %v839_v14 = vpack.c.bf16 %v261_v11, %v259_v10  ;;  %v263_v16 = vld [vmem:[#allocation5 + $0x40] sm:$0xff]  ;;  %s1118_s28 = scalar_lea.vmem %s1516_s5, 4096  ;;  %s1197_s29 = smov [#allocation7]  }
  0x5a   : > { %836 = vmatpush1.bf16.msra.mxu1 %v835_v8  ;;  %v841_v15 = vpack.c.bf16 %v266_v13, %v264_v12  ;;  %v265_v17 = vld [vmem:[#allocation5 + $0x50] sm:$0xff]  ;;  %v268_v18 = vld [vmem:[#allocation5 + $0x68] sm:$0xff]  ;;  %v270_v19 = vld [vmem:[#allocation5 + $0x78] sm:$0xff]  ;;  %p1119_p4 = scmp.ne.s32.totalorder %s1516_s5, %s1118_s28  ;;  %s1122_s23 = sshll.u32 %s1197_s29, 4  ;;  %s1123_s23 = int_to_ptr.vmem [resolvable:$false] %s1122_s23 }
  0x5b   : > { %838 = vmatprep.subr.bf16.mxu1 %v837_v9  ;;  %v843_v20 = vpack.c.bf16 %v265_v17, %v263_v16  ;;  %v845_v21 = vpack.c.bf16 %v270_v19, %v268_v18  ;;  %v267_v22 = vld [vmem:[#allocation5 + $0x60] sm:$0xff]  ;;  %v269_v23 = vld [vmem:[#allocation5 + $0x70] sm:$0xff]  ;;  %v272_v24 = vld [vmem:[#allocation5 + $0x88] sm:$0xff]  ;;  %s1124_s30 = scalar_lea.vmem %s1123_s23, 8192  ;;  %p1125_p10 = scmp.lt.s32.totalorder %s1516_s5, %s1123_s23 }
  0x5c   : > { %v274_v25 = vld [vmem:[#allocation5 + $0x98] sm:$0xff]  ;;  %v847_v26 = vpack.c.bf16 %v269_v23, %v267_v22  ;;  %v320_v27 = vld [vmem:[#allocation5 + $0x208] sm:$0xff]  ;;  %v319_v29 = vld [vmem:[#allocation5 + $0x200] sm:$0xff]  ;;  %p1120_p6 = pnand %p1119_p4, %p1311_p12  ;;  %p1126_p13 = scmp.lt.s32.totalorder %s1124_s30, %s1118_s28 }
  0x5d   : > { %v322_v28 = vld [vmem:[#allocation5 + $0x218] sm:$0xff]  ;;  %v849_v30 = vpack.c.bf16 %v274_v25, %v272_v24  ;;  %v271_v31 = vld [vmem:[#allocation5 + $0x80] sm:$0xff]  ;;  %v273_v32 = vld [vmem:[#allocation5 + $0x90] sm:$0xff] }
  0x5e   : > { %840 = vmatpush1.bf16.msra.mxu1 %v839_v14  ;;  %v897_v33 = vpack.c.bf16 %v322_v28, %v320_v27  ;;  %v321_v34 = vld [vmem:[#allocation5 + $0x210] sm:$0xff]  ;;  %v276_v35 = vld [vmem:[#allocation5 + $0xa8] sm:$0xff]  ;;  %v278_v36 = vld [vmem:[#allocation5 + $0xb8] sm:$0xff]  ;;  %v851_v42 = vpack.c.bf16 %v273_v32, %v271_v31  ;;  %p1121_p8 = pneg %p1120_p6  ;;  %p1127_p3 = por %p1126_p13, %p1125_p10 }
  0x5f   : > { %842 = vmatprep.subr.bf16.mxu1 %v841_v15  ;;  %v899_v37 = vpack.c.bf16 %v321_v34, %v319_v29  ;;  %v324_v38 = vld [vmem:[#allocation5 + $0x228] sm:$0xff]  ;;  %v326_v39 = vld [vmem:[#allocation5 + $0x238] sm:$0xff]  ;;  %v323_v40 = vld [vmem:[#allocation5 + $0x220] sm:$0xff]  ;;  %v853_v47 = vpack.c.bf16 %v278_v36, %v276_v35 }
  0x60   : > { %898 = vmatprep.subr.bf16.mxu0 %v897_v33  ;;  %v325_v41 = vld [vmem:[#allocation5 + $0x230] sm:$0xff]  ;;  %v275_v43 = vld [vmem:[#allocation5 + $0xa0] sm:$0xff]  ;;  %v901_v45 = vpack.c.bf16 %v326_v39, %v324_v38  ;;  %v280_v48 = vld [vmem:[#allocation5 + $0xc8] sm:$0xff]  ;;  %p1128_p7 = pnand %p1127_p3, %p1121_p8 }
  0x61   : > { %v277_v44 = vld [vmem:[#allocation5 + $0xb0] sm:$0xff]  ;;  %900 = vmatpush1.bf16.msra.mxu0 %v899_v37  ;;  %v903_v46 = vpack.c.bf16 %v325_v41, %v323_v40  ;;  %v328_v49 = vld [vmem:[#allocation5 + $0x248] sm:$0xff]  ;;  %v330_v50 = vld [vmem:[#allocation5 + $0x258] sm:$0xff] }
  0x62   : > { %844 = vmatpush1.bf16.msra.mxu1 %v843_v20  ;;  %v282_v51 = vld [vmem:[#allocation5 + $0xd8] sm:$0xff]  ;;  %902 = vmatprep.subr.bf16.mxu0 %v901_v45  ;;  %v905_v52 = vpack.c.bf16 %v330_v50, %v328_v49  ;;  %v327_v53 = vld [vmem:[#allocation5 + $0x240] sm:$0xff]  ;;  %v329_v54 = vld [vmem:[#allocation5 + $0x250] sm:$0xff]  ;;  %v855_v55 = vpack.c.bf16 %v277_v44, %v275_v43 }
  0x63   : > { %846 = vmatprep.subr.bf16.mxu1 %v845_v21  ;;  %v279_v56 = vld [vmem:[#allocation5 + $0xc0] sm:$0xff]  ;;  %v907_v57 = vpack.c.bf16 %v329_v54, %v327_v53  ;;  %v332_v58 = vld [vmem:[#allocation5 + $0x268] sm:$0xff]  ;;  %v334_v59 = vld [vmem:[#allocation5 + $0x278] sm:$0xff]  ;;  %v857_v60 = vpack.c.bf16 %v282_v51, %v280_v48 }
  0x64   : > { %v281_v61 = vld [vmem:[#allocation5 + $0xd0] sm:$0xff]  ;;  %v909_v62 = vpack.c.bf16 %v334_v59, %v332_v58  ;;  %v331_v63 = vld [vmem:[#allocation5 + $0x260] sm:$0xff]  ;;  %v284_v2 = vld [vmem:[#allocation5 + $0xe8] sm:$0xff] }
  0x65   : > { %904 = vmatpush1.bf16.msra.mxu0 %v903_v46  ;;  %v333_v1 = vld [vmem:[#allocation5 + $0x270] sm:$0xff]  ;;  %v286_v3 = vld [vmem:[#allocation5 + $0xf8] sm:$0xff]  ;;  %v336_v4 = vld [vmem:[#allocation5 + $0x288] sm:$0xff]  ;;  %v859_v6 = vpack.c.bf16 %v281_v61, %v279_v56 }
  0x66   : > { %848 = vmatpush1.bf16.msra.mxu1 %v847_v26  ;;  %906 = vmatprep.subr.bf16.mxu0 %v905_v52  ;;  %v338_v5 = vld [vmem:[#allocation5 + $0x298] sm:$0xff]  ;;  %v283_v7 = vld [vmem:[#allocation5 + $0xe0] sm:$0xff]  ;;  %v285_v8 = vld [vmem:[#allocation5 + $0xf0] sm:$0xff]  ;;  %v911_v9 = vpack.c.bf16 %v333_v1, %v331_v63  ;;  %v861_v10 = vpack.c.bf16 %v286_v3, %v284_v2 }
  0x67   : > { %850 = vmatprep.subr.bf16.mxu1 %v849_v30  ;;  %v288_v11 = vld [vmem:[#allocation5 + $0x108] sm:$0xff]  ;;  %v913_v12 = vpack.c.bf16 %v338_v5, %v336_v4  ;;  %v335_v13 = vld [vmem:[#allocation5 + $0x280] sm:$0xff]  ;;  %v337_v14 = vld [vmem:[#allocation5 + $0x290] sm:$0xff]  ;;  %v863_v18 = vpack.c.bf16 %v285_v8, %v283_v7 }
  0x68   : > { %v290_v15 = vld [vmem:[#allocation5 + $0x118] sm:$0xff]  ;;  %v340_v16 = vld [vmem:[#allocation5 + $0x2a8] sm:$0xff]  ;;  %v287_v19 = vld [vmem:[#allocation5 + $0x100] sm:$0xff]  ;;  %v915_v21 = vpack.c.bf16 %v337_v14, %v335_v13 }
  0x69   : > { %908 = vmatpush1.bf16.msra.mxu0 %v907_v57  ;;  %v342_v17 = vld [vmem:[#allocation5 + $0x2b8] sm:$0xff]  ;;  %v289_v20 = vld [vmem:[#allocation5 + $0x110] sm:$0xff]  ;;  %v865_v22 = vpack.c.bf16 %v290_v15, %v288_v11  ;;  %v292_v23 = vld [vmem:[#allocation5 + $0x128] sm:$0xff] }
  0x6a   : > { %852 = vmatpush1.bf16.msra.mxu1 %v851_v42  ;;  %910 = vmatprep.subr.bf16.mxu0 %v909_v62  ;;  %v917_v24 = vpack.c.bf16 %v342_v17, %v340_v16  ;;  %v339_v25 = vld [vmem:[#allocation5 + $0x2a0] sm:$0xff]  ;;  %v341_v26 = vld [vmem:[#allocation5 + $0x2b0] sm:$0xff]  ;;  %v294_v27 = vld [vmem:[#allocation5 + $0x138] sm:$0xff]  ;;  %v867_v30 = vpack.c.bf16 %v289_v20, %v287_v19 }
  0x6b   : > { %854 = vmatprep.subr.bf16.mxu1 %v853_v47  ;;  %v344_v28 = vld [vmem:[#allocation5 + $0x2c8] sm:$0xff]  ;;  %v346_v29 = vld [vmem:[#allocation5 + $0x2d8] sm:$0xff]  ;;  %v291_v31 = vld [vmem:[#allocation5 + $0x120] sm:$0xff]  ;;  %v919_v33 = vpack.c.bf16 %v341_v26, %v339_v25  ;;  %v869_v35 = vpack.c.bf16 %v294_v27, %v292_v23 }
  0x6c   : > { %v293_v32 = vld [vmem:[#allocation5 + $0x130] sm:$0xff]  ;;  %v208_v34 = vld [vmem:[%s1363_s9 + $0x8] sm:$0xff]  ;;  %v921_v37 = vpack.c.bf16 %v346_v29, %v344_v28  ;;  %v343_v38 = vld [vmem:[#allocation5 + $0x2c0] sm:$0xff] }
  0x6d   : > { %912 = vmatpush1.bf16.msra.mxu0 %v911_v9  ;;  %v296_v36 = vld [vmem:[#allocation5 + $0x148] sm:$0xff]  ;;  %v345_v39 = vld [vmem:[#allocation5 + $0x2d0] sm:$0xff]  ;;  %v298_v40 = vld [vmem:[#allocation5 + $0x158] sm:$0xff]  ;;  %427 = vmatprep.mubr.f32.mxu1 %v208_v34  ;;  %v871_v43 = vpack.c.bf16 %v293_v32, %v291_v31 }
  0x6e   : > { %856 = vmatpush1.bf16.msra.mxu1 %v855_v55  ;;  %914 = vmatprep.subr.bf16.mxu0 %v913_v12  ;;  %v348_v41 = vld [vmem:[#allocation5 + $0x2e8] sm:$0xff]  ;;  %v350_v42 = vld [vmem:[#allocation5 + $0x2f8] sm:$0xff]  ;;  %v295_v44 = vld [vmem:[#allocation5 + $0x140] sm:$0xff]  ;;  %v923_v45 = vpack.c.bf16 %v345_v39, %v343_v38  ;;  %v873_v46 = vpack.c.bf16 %v298_v40, %v296_v36 }
  0x6f   : > { %858 = vmatprep.subr.bf16.mxu1 %v857_v60  ;;  %v297_v47 = vld [vmem:[#allocation5 + $0x150] sm:$0xff]  ;;  %v925_v48 = vpack.c.bf16 %v350_v42, %v348_v41  ;;  %v347_v49 = vld [vmem:[#allocation5 + $0x2e0] sm:$0xff]  ;;  %v300_v51 = vld [vmem:[#allocation5 + $0x168] sm:$0xff] }
  0x70   : > { %v349_v50 = vld [vmem:[#allocation5 + $0x2f0] sm:$0xff]  ;;  %v302_v52 = vld [vmem:[#allocation5 + $0x178] sm:$0xff]  ;;  %v875_v53 = vpack.c.bf16 %v297_v47, %v295_v44  ;;  %v299_v56 = vld [vmem:[#allocation5 + $0x160] sm:$0xff] }
  0x71   : > { %916 = vmatpush1.bf16.msra.mxu0 %v915_v21  ;;  %v927_v54 = vpack.c.bf16 %v349_v50, %v347_v49  ;;  %v877_v55 = vpack.c.bf16 %v302_v52, %v300_v51  ;;  %v301_v57 = vld [vmem:[#allocation5 + $0x170] sm:$0xff]  ;;  %v304_v58 = vld [vmem:[#allocation5 + $0x188] sm:$0xff]  ;;  %v306_v59 = vld [vmem:[#allocation5 + $0x198] sm:$0xff] }
  0x72   : > { %860 = vmatpush1.bf16.msra.mxu1 %v859_v6  ;;  %918 = vmatprep.subr.bf16.mxu0 %v917_v24  ;;  %v879_v60 = vpack.c.bf16 %v301_v57, %v299_v56  ;;  %v209_v61 = vld [vmem:[%s1363_s9 + $0x10] sm:$0xff]  ;;  %v881_v62 = vpack.c.bf16 %v306_v59, %v304_v58  ;;  %v303_v63 = vld [vmem:[#allocation5 + $0x180] sm:$0xff]  ;;  %v308_v2 = vld [vmem:[#allocation5 + $0x1a8] sm:$0xff] }
  0x73   : > { %862 = vmatprep.subr.bf16.mxu1 %v861_v10  ;;  %v305_v1 = vld [vmem:[#allocation5 + $0x190] sm:$0xff]  ;;  %v310_v3 = vld [vmem:[#allocation5 + $0x1b8] sm:$0xff]  ;;  %v212_v5 = vld [vmem:[%s1363_s9 + $0x28] sm:$0xff] }
  0x74   : > { %v883_v4 = vpack.c.bf16 %v305_v1, %v303_v63  ;;  %v885_v6 = vpack.c.bf16 %v310_v3, %v308_v2  ;;  %v307_v7 = vld [vmem:[#allocation5 + $0x1a0] sm:$0xff]  ;;  %v309_v8 = vld [vmem:[#allocation5 + $0x1b0] sm:$0xff]  ;;  %v312_v9 = vld [vmem:[#allocation5 + $0x1c8] sm:$0xff] }
  0x75   : > { %920 = vmatpush1.bf16.msra.mxu0 %v919_v33  ;;  %v314_v10 = vld [vmem:[#allocation5 + $0x1d8] sm:$0xff]  ;;  %v887_v11 = vpack.c.bf16 %v309_v8, %v307_v7  ;;  %v215_v12 = vld [vmem:[%s1363_s9 + $0x40] sm:$0xff]  ;;  %v313_v15 = vld [vmem:[#allocation5 + $0x1d0] sm:$0xff] }
  0x76   : > { %864 = vmatpush1.bf16.msra.mxu1 %v863_v18  ;;  %922 = vmatprep.subr.bf16.mxu0 %v921_v37  ;;  %v889_v13 = vpack.c.bf16 %v314_v10, %v312_v9  ;;  %v311_v14 = vld [vmem:[#allocation5 + $0x1c0] sm:$0xff]  ;;  %v316_v16 = vld [vmem:[#allocation5 + $0x1e8] sm:$0xff]  ;;  %v318_v17 = vld [vmem:[#allocation5 + $0x1f8] sm:$0xff] }
  0x77   : > { %866 = vmatprep.subr.bf16.mxu1 %v865_v22  ;;  %v891_v18 = vpack.c.bf16 %v313_v15, %v311_v14  ;;  %v218_v19 = vld [vmem:[%s1363_s9 + $0x58] sm:$0xff]  ;;  %v893_v20 = vpack.c.bf16 %v318_v17, %v316_v16  ;;  %v315_v21 = vld [vmem:[#allocation5 + $0x1e0] sm:$0xff]  ;;  %v317_v22 = vld [vmem:[#allocation5 + $0x1f0] sm:$0xff] }
  0x78   : > { %v895_v23 = vpack.c.bf16 %v317_v22, %v315_v21  ;;  %v221_v24 = vld [vmem:[%s1363_s9 + $0x70] sm:$0xff]  ;;  %v207_v25 = vld [vmem:[%s1363_s9] sm:$0xff]  ;;  %v224_v26 = vld [vmem:[%s1363_s9 + $0x88] sm:$0xff] }
  0x79   : > { %924 = vmatpush1.bf16.msra.mxu0 %v923_v45  ;;  %v211_v27 = vld [vmem:[%s1363_s9 + $0x20] sm:$0xff]  ;;  %v210_v28 = vld [vmem:[%s1363_s9 + $0x18] sm:$0xff]  ;;  %v213_v31 = vld [vmem:[%s1363_s9 + $0x30] sm:$0xff] }
  0x7a   : > { %868 = vmatpush1.bf16.msra.mxu1 %v867_v30  ;;  %926 = vmatprep.subr.bf16.mxu0 %v925_v48  ;;  %v227_v29 = vld [vmem:[%s1363_s9 + $0xa0] sm:$0xff]  ;;  %v214_v30 = vld [vmem:[%s1363_s9 + $0x38] sm:$0xff]  ;;  %v217_v33 = vld [vmem:[%s1363_s9 + $0x50] sm:$0xff] }
  0x7b   : > { %870 = vmatprep.subr.bf16.mxu1 %v869_v35  ;;  %v230_v32 = vld [vmem:[%s1363_s9 + $0xb8] sm:$0xff]  ;;  %v216_v34 = vld [vmem:[%s1363_s9 + $0x48] sm:$0xff]  ;;  %v233_v35 = vld [vmem:[%s1363_s9 + $0xd0] sm:$0xff] }
  0x7c   : > { %v220_v36 = vld [vmem:[%s1363_s9 + $0x68] sm:$0xff]  ;;  %v219_v37 = vld [vmem:[%s1363_s9 + $0x60] sm:$0xff]  ;;  %v222_v40 = vld [vmem:[%s1363_s9 + $0x78] sm:$0xff] }
  0x7d   : > { %928 = vmatpush1.bf16.msra.mxu0 %v927_v54  ;;  %v236_v38 = vld [vmem:[%s1363_s9 + $0xe8] sm:$0xff]  ;;  %v223_v39 = vld [vmem:[%s1363_s9 + $0x80] sm:$0xff]  ;;  %v226_v42 = vld [vmem:[%s1363_s9 + $0x98] sm:$0xff] }
  0x7e   : > { %872 = vmatpush1.bf16.msra.mxu1 %v871_v43  ;;  %v239_v41 = vld [vmem:[%s1363_s9 + $0x100] sm:$0xff]  ;;  %v225_v43 = vld [vmem:[%s1363_s9 + $0x90] sm:$0xff]  ;;  %v242_v44 = vld [vmem:[%s1363_s9 + $0x118] sm:$0xff] }
  0x7f   : > { %874 = vmatprep.subr.bf16.mxu1 %v873_v46  ;;  %v229_v45 = vld [vmem:[%s1363_s9 + $0xb0] sm:$0xff]  ;;  %v228_v46 = vld [vmem:[%s1363_s9 + $0xa8] sm:$0xff]  ;;  %v231_v49 = vld [vmem:[%s1363_s9 + $0xc0] sm:$0xff] }
  0x80   : > { %589 = vmatmul.mubr.f32.vlgmr.msra.gmra.mrb[0].mxu0 %v209_v61  ;;  %v245_v47 = vld [vmem:[%s1363_s9 + $0x130] sm:$0xff]  ;;  %v232_v48 = vld [vmem:[%s1363_s9 + $0xc8] sm:$0xff]  ;;  %v235_v51 = vld [vmem:[%s1363_s9 + $0xe0] sm:$0xff] }
  0x81   : > { %594 = vmatprep.mubr.f32.mxu0 %v1196_v0  ;;  %v248_v50 = vld [vmem:[%s1363_s9 + $0x148] sm:$0xff]  ;;  %v234_v52 = vld [vmem:[%s1363_s9 + $0xd8] sm:$0xff]  ;;  %v241_v57 = vld [vmem:[%s1363_s9 + $0x110] sm:$0xff] }
  0x82   : > { %876 = vmatpush1.bf16.msra.mxu1 %v875_v53  ;;  %v251_v53 = vld [vmem:[%s1363_s9 + $0x160] sm:$0xff]  ;;  %v238_v54 = vld [vmem:[%s1363_s9 + $0xf8] sm:$0xff]  ;;  %v240_v58 = vld [vmem:[%s1363_s9 + $0x108] sm:$0xff] }
  0x83   : > { %878 = vmatprep.subr.bf16.mxu1 %v877_v55  ;;  %v237_v55 = vld [vmem:[%s1363_s9 + $0xf0] sm:$0xff]  ;;  %v254_v56 = vld [vmem:[%s1363_s9 + $0x178] sm:$0xff]  ;;  %v244_v59 = vld [vmem:[%s1363_s9 + $0x128] sm:$0xff] }
  0x84   : > { %595 = vmatmul.mubr.f32.gmra.mrb[2].mxu0 %v212_v5  ;;  %v247_v61 = vld [vmem:[%s1363_s9 + $0x140] sm:$0xff]  ;;  %v250_v63 = vld [vmem:[%s1363_s9 + $0x158] sm:$0xff]  ;;  %v253_v1 = vld [vmem:[%s1363_s9 + $0x170] sm:$0xff] }
  0x85   : > { %600 = vmatprep.mubr.f32.mxu0 %v1196_v0  ;;  %v252_v2 = vld [vmem:[%s1363_s9 + $0x168] sm:$0xff]  ;;  %v351_v14 = vld [vmem:[%s1564_s2] sm:$0x3] }
  0x86   : > { %880 = vmatpush1.bf16.msra.mxu1 %v879_v60  ;;  %v243_v60 = vld [vmem:[%s1363_s9 + $0x120] sm:$0xff] }
  0x87   : > { %882 = vmatprep.subr.bf16.mxu1 %v881_v62  ;;  %v246_v62 = vld [vmem:[%s1363_s9 + $0x138] sm:$0xff] }
  0x88   : > { %601 = vmatmul.mubr.f32.gmra.mrb[4].mxu0 %v215_v12 }
  0x89   : > { %606 = vmatprep.mubr.f32.mxu0 %v1196_v0 }
  0x8a   : > { %884 = vmatpush1.bf16.msra.mxu1 %v883_v4 }
  0x8b   : > { %886 = vmatprep.subr.bf16.mxu1 %v885_v6  ;;  %v353_v6 = vlaneseq }
  0x8c   : > { %607 = vmatmul.mubr.f32.gmra.mrb[6].mxu0 %v218_v19 }
  0x8d   : > { %612 = vmatprep.mubr.f32.mxu0 %v1196_v0  ;;  %v354_v9 = vshrl.u32 %v353_v6, 7 }
  0x8e   : > { %888 = vmatpush1.bf16.msra.mxu1 %v887_v11 }
  0x8f   : > { %890 = vmatprep.subr.bf16.mxu1 %v889_v13  ;;  %v355_v12 = vsub.s32 0, %v354_v9  ;;  %v359_v15 = vsub.s32 1, %v354_v9 }
  0x90   : > { %613 = vmatmul.mubr.f32.gmra.mrb[8].mxu0 %v221_v24 }
  0x91   : > { %618 = vmatprep.mubr.f32.mxu0 %v1196_v0  ;;  %v1440_v17 = vrot.slane %v351_v14, %v355_v12  ;;  %v1442_v19 = vrot.slane %v351_v14, %v359_v15 }
  0x92   : > { %892 = vmatpush1.bf16.msra.mxu1 %v891_v18 }
  0x93   : > { %894 = vmatprep.subr.bf16.mxu1 %v893_v20 }
  0x94   : > { %619 = vmatmul.mubr.f32.gmra.mrb[10].mxu0 %v224_v26 }
  0x95   : > { %624 = vmatprep.mubr.f32.mxu0 %v1196_v0 }
  0x96   : > { %896 = vmatpush1.bf16.msra.mxu1 %v895_v23 }
  0x98   : > { %625 = vmatmul.mubr.f32.gmra.mrb[12].mxu0 %v227_v29 }
  0x99   : > { %428 = vmatmul.mubr.f32.vlgmr.msra.gmra.mrb[0].mxu1 %v207_v25  ;;  %630 = vmatprep.mubr.f32.mxu0 %v1196_v0 }
  0x9a   : > { %433 = vmatprep.mubr.f32.mxu1 %v211_v27 }
  0x9c   : > { %631 = vmatmul.mubr.f32.gmra.mrb[14].mxu0 %v230_v32 }
  0x9d   : > { %434 = vmatmul.mubr.f32.gmra.mrb[2].mxu1 %v210_v28  ;;  %636 = vmatprep.mubr.f32.mxu0 %v1196_v0 }
  0x9e   : > { %439 = vmatprep.mubr.f32.mxu1 %v214_v30 }
  0xa0   : > { %637 = vmatmul.mubr.f32.gmra.mrb[16].mxu0 %v233_v35 }
  0xa1   : > { %440 = vmatmul.mubr.f32.gmra.mrb[4].mxu1 %v213_v31  ;;  %642 = vmatprep.mubr.f32.mxu0 %v1196_v0 }
  0xa2   : > { %445 = vmatprep.mubr.f32.mxu1 %v217_v33 }
  0xa4   : > { %643 = vmatmul.mubr.f32.gmra.mrb[18].mxu0 %v236_v38 }
  0xa5   : > { %446 = vmatmul.mubr.f32.gmra.mrb[6].mxu1 %v216_v34  ;;  %648 = vmatprep.mubr.f32.mxu0 %v1196_v0 }
  0xa6   : > { %451 = vmatprep.mubr.f32.mxu1 %v220_v36 }
  0xa8   : > { %649 = vmatmul.mubr.f32.gmra.mrb[20].mxu0 %v239_v41 }
  0xa9   : > { %452 = vmatmul.mubr.f32.gmra.mrb[8].mxu1 %v219_v37  ;;  %654 = vmatprep.mubr.f32.mxu0 %v1196_v0 }
  0xaa   : > { %457 = vmatprep.mubr.f32.mxu1 %v223_v39 }
  0xac   : > { %655 = vmatmul.mubr.f32.gmra.mrb[22].mxu0 %v242_v44 }
  0xad   : > { %458 = vmatmul.mubr.f32.gmra.mrb[10].mxu1 %v222_v40  ;;  %660 = vmatprep.mubr.f32.mxu0 %v1196_v0 }
  0xae   : > { %463 = vmatprep.mubr.f32.mxu1 %v226_v42 }
  0xb0   : > { %661 = vmatmul.mubr.f32.gmra.mrb[24].mxu0 %v245_v47 }
  0xb1   : > { %464 = vmatmul.mubr.f32.gmra.mrb[12].mxu1 %v225_v43  ;;  %666 = vmatprep.mubr.f32.mxu0 %v1196_v0 }
  0xb2   : > { %469 = vmatprep.mubr.f32.mxu1 %v229_v45 }
  0xb4   : > { %667 = vmatmul.mubr.f32.gmra.mrb[26].mxu0 %v248_v50 }
  0xb5   : > { %470 = vmatmul.mubr.f32.gmra.mrb[14].mxu1 %v228_v46  ;;  %672 = vmatprep.mubr.f32.mxu0 %v1196_v0 }
  0xb6   : > { %475 = vmatprep.mubr.f32.mxu1 %v232_v48 }
  0xb8   : > { %673 = vmatmul.mubr.f32.gmra.mrb[28].mxu0 %v251_v53 }
  0xb9   : > { %476 = vmatmul.mubr.f32.gmra.mrb[16].mxu1 %v231_v49  ;;  %678 = vmatprep.mubr.f32.mxu0 %v1196_v0  ;;  %v249_v0 = vld [vmem:[%s1363_s9 + $0x150] sm:$0xff] }
  0xba   : > { %481 = vmatprep.mubr.f32.mxu1 %v235_v51 }
  0xbc   : > { %679 = vmatmul.mubr.f32.gmra.mrb[30].mxu0 %v254_v56 }
  0xbd   : > { %482 = vmatmul.mubr.f32.gmra.mrb[18].mxu1 %v234_v52 }
  0xbe   : > { %487 = vmatprep.mubr.f32.mxu1 %v238_v54 }
  0xc1   : > { %488 = vmatmul.mubr.f32.gmra.mrb[20].mxu1 %v237_v55 }
  0xc2   : > { %493 = vmatprep.mubr.f32.mxu1 %v241_v57 }
  0xc5   : > { %494 = vmatmul.mubr.f32.gmra.mrb[22].mxu1 %v240_v58 }
  0xc6   : > { %499 = vmatprep.mubr.f32.mxu1 %v244_v59 }
  0xc9   : > { %500 = vmatmul.mubr.f32.gmra.mrb[24].mxu1 %v243_v60 }
  0xca   : > { %505 = vmatprep.mubr.f32.mxu1 %v247_v61 }
  0xcd   : > { %506 = vmatmul.mubr.f32.gmra.mrb[26].mxu1 %v246_v62 }
  0xce   : > { %511 = vmatprep.mubr.f32.mxu1 %v250_v63 }
  0xd1   : > { %512 = vmatmul.mubr.f32.gmra.mrb[28].mxu1 %v249_v0 }
  0xd2   : > { %517 = vmatprep.mubr.f32.mxu1 %v253_v1 }
  0xd5   : > { %518 = vmatmul.mubr.f32.gmra.mrb[30].mxu1 %v252_v2 }
 0x153   : > { %v590_v3 = vpop.f32.mrb[0].mxu0 }
 0x154   : > { %v592_v4 = vpop.f32.mrb[1].mxu0 }
 0x157   : > { %v596_v5 = vpop.f32.mrb[2].mxu0 }
 0x158   : > { %v598_v7 = vpop.f32.mrb[3].mxu0 }
 0x15b   : > { %v602_v8 = vpop.f32.mrb[4].mxu0 }
 0x15c   : > { %v604_v10 = vpop.f32.mrb[5].mxu0 }
 0x15f   : > { %v608_v11 = vpop.f32.mrb[6].mxu0 }
 0x160   : > { %v610_v13 = vpop.f32.mrb[7].mxu0 }
 0x163   : > { %v614_v16 = vpop.f32.mrb[8].mxu0 }
 0x164   : > { %v616_v18 = vpop.f32.mrb[9].mxu0 }
 0x167   : > { %v620_v21 = vpop.f32.mrb[10].mxu0 }
 0x168   : > { %v622_v24 = vpop.f32.mrb[11].mxu0 }
 0x16b   : > { %v626_v29 = vpop.f32.mrb[12].mxu0 }
 0x16c   : > { %v429_v20 = vpop.f32.mrb[0].mxu1  ;;  %v628_v32 = vpop.f32.mrb[13].mxu0 }
 0x16d   : > { %v430_v22 = vadd.f32 %v429_v20, %v1440_v17  ;;  %v431_v23 = vpop.f32.mrb[1].mxu1 }
 0x16e   : > { %v432_v25 = vadd.f32 %v431_v23, %v1442_v19 }
 0x16f   : > { %v591_v26 = vadd.f32 %v590_v3, %v430_v22  ;;  %v632_v37 = vpop.f32.mrb[14].mxu0 }
 0x170   : > { %v593_v27 = vadd.f32 %v592_v4, %v432_v25  ;;  %v435_v28 = vpop.f32.mrb[2].mxu1  ;;  %v634_v40 = vpop.f32.mrb[15].mxu0 }
 0x171   : > { %685 = vst [vmem:[%s1447_s22] sm:$0xff] %v591_v26  ;;  %v436_v30 = vadd.f32 %v435_v28, %v1440_v17  ;;  %v437_v31 = vpop.f32.mrb[3].mxu1 }
 0x172   : > { %686 = vst [vmem:[%s1447_s22 + $0x8] sm:$0xff] %v593_v27  ;;  %v438_v33 = vadd.f32 %v437_v31, %v1442_v19 }
 0x173   : > { %v597_v34 = vadd.f32 %v596_v5, %v436_v30  ;;  %v638_v45 = vpop.f32.mrb[16].mxu0 }
 0x174   : > { %v599_v35 = vadd.f32 %v598_v7, %v438_v33  ;;  %v441_v36 = vpop.f32.mrb[4].mxu1  ;;  %v640_v48 = vpop.f32.mrb[17].mxu0 }
 0x175   : > { %687 = vst [vmem:[%s1447_s22 + $0x10] sm:$0xff] %v597_v34  ;;  %v442_v38 = vadd.f32 %v441_v36, %v1440_v17  ;;  %v443_v39 = vpop.f32.mrb[5].mxu1 }
 0x176   : > { %688 = vst [vmem:[%s1447_s22 + $0x18] sm:$0xff] %v599_v35  ;;  %v444_v41 = vadd.f32 %v443_v39, %v1442_v19 }
 0x177   : > { %v603_v42 = vadd.f32 %v602_v8, %v442_v38  ;;  %v644_v53 = vpop.f32.mrb[18].mxu0 }
 0x178   : > { %v605_v43 = vadd.f32 %v604_v10, %v444_v41  ;;  %v447_v44 = vpop.f32.mrb[6].mxu1  ;;  %v646_v56 = vpop.f32.mrb[19].mxu0 }
 0x179   : > { %689 = vst [vmem:[%s1447_s22 + $0x20] sm:$0xff] %v603_v42  ;;  %v448_v46 = vadd.f32 %v447_v44, %v1440_v17  ;;  %v449_v47 = vpop.f32.mrb[7].mxu1 }
 0x17a   : > { %690 = vst [vmem:[%s1447_s22 + $0x28] sm:$0xff] %v605_v43  ;;  %v450_v49 = vadd.f32 %v449_v47, %v1442_v19 }
 0x17b   : > { %v609_v50 = vadd.f32 %v608_v11, %v448_v46  ;;  %v650_v61 = vpop.f32.mrb[20].mxu0 }
 0x17c   : > { %v611_v51 = vadd.f32 %v610_v13, %v450_v49  ;;  %v453_v52 = vpop.f32.mrb[8].mxu1  ;;  %v652_v0 = vpop.f32.mrb[21].mxu0 }
 0x17d   : > { %691 = vst [vmem:[%s1447_s22 + $0x30] sm:$0xff] %v609_v50  ;;  %v454_v54 = vadd.f32 %v453_v52, %v1440_v17  ;;  %v455_v55 = vpop.f32.mrb[9].mxu1 }
 0x17e   : > { %692 = vst [vmem:[%s1447_s22 + $0x38] sm:$0xff] %v611_v51  ;;  %v456_v57 = vadd.f32 %v455_v55, %v1442_v19 }
 0x17f   : > { %v615_v58 = vadd.f32 %v614_v16, %v454_v54  ;;  %v656_v5 = vpop.f32.mrb[22].mxu0 }
 0x180   : > { %v617_v59 = vadd.f32 %v616_v18, %v456_v57  ;;  %v459_v60 = vpop.f32.mrb[10].mxu1  ;;  %v658_v8 = vpop.f32.mrb[23].mxu0 }
 0x181   : > { %693 = vst [vmem:[%s1447_s22 + $0x40] sm:$0xff] %v615_v58  ;;  %v460_v62 = vadd.f32 %v459_v60, %v1440_v17  ;;  %v461_v63 = vpop.f32.mrb[11].mxu1 }
 0x182   : > { %694 = vst [vmem:[%s1447_s22 + $0x48] sm:$0xff] %v617_v59  ;;  %v462_v1 = vadd.f32 %v461_v63, %v1442_v19 }
 0x183   : > { %v621_v2 = vadd.f32 %v620_v21, %v460_v62  ;;  %v662_v13 = vpop.f32.mrb[24].mxu0 }
 0x184   : > { %v623_v3 = vadd.f32 %v622_v24, %v462_v1  ;;  %v465_v4 = vpop.f32.mrb[12].mxu1  ;;  %v664_v16 = vpop.f32.mrb[25].mxu0 }
 0x185   : > { %695 = vst [vmem:[%s1447_s22 + $0x50] sm:$0xff] %v621_v2  ;;  %v466_v6 = vadd.f32 %v465_v4, %v1440_v17  ;;  %v467_v7 = vpop.f32.mrb[13].mxu1 }
 0x186   : > { %696 = vst [vmem:[%s1447_s22 + $0x58] sm:$0xff] %v623_v3  ;;  %v468_v9 = vadd.f32 %v467_v7, %v1442_v19 }
 0x187   : > { %v627_v10 = vadd.f32 %v626_v29, %v466_v6  ;;  %v668_v23 = vpop.f32.mrb[26].mxu0 }
 0x188   : > { %v629_v11 = vadd.f32 %v628_v32, %v468_v9  ;;  %v471_v12 = vpop.f32.mrb[14].mxu1  ;;  %v670_v26 = vpop.f32.mrb[27].mxu0 }
 0x189   : > { %697 = vst [vmem:[%s1447_s22 + $0x60] sm:$0xff] %v627_v10  ;;  %v472_v14 = vadd.f32 %v471_v12, %v1440_v17  ;;  %v473_v15 = vpop.f32.mrb[15].mxu1 }
 0x18a   : > { %698 = vst [vmem:[%s1447_s22 + $0x68] sm:$0xff] %v629_v11  ;;  %v474_v18 = vadd.f32 %v473_v15, %v1442_v19 }
 0x18b   : > { %v633_v20 = vadd.f32 %v632_v37, %v472_v14  ;;  %v674_v31 = vpop.f32.mrb[28].mxu0 }
 0x18c   : > { %v635_v21 = vadd.f32 %v634_v40, %v474_v18  ;;  %v477_v22 = vpop.f32.mrb[16].mxu1  ;;  %v676_v34 = vpop.f32.mrb[29].mxu0 }
 0x18d   : > { %699 = vst [vmem:[%s1447_s22 + $0x70] sm:$0xff] %v633_v20  ;;  %v478_v24 = vadd.f32 %v477_v22, %v1440_v17  ;;  %v479_v25 = vpop.f32.mrb[17].mxu1 }
 0x18e   : > { %700 = vst [vmem:[%s1447_s22 + $0x78] sm:$0xff] %v635_v21  ;;  %v480_v27 = vadd.f32 %v479_v25, %v1442_v19 }
 0x18f   : > { %v639_v28 = vadd.f32 %v638_v45, %v478_v24  ;;  %v680_v39 = vpop.f32.mrb[30].mxu0 }
 0x190   : > { %v641_v29 = vadd.f32 %v640_v48, %v480_v27  ;;  %v483_v30 = vpop.f32.mrb[18].mxu1  ;;  %v682_v42 = vpop.f32.mrb[31].mxu0 }
 0x191   : > { %701 = vst [vmem:[%s1447_s22 + $0x80] sm:$0xff] %v639_v28  ;;  %v484_v32 = vadd.f32 %v483_v30, %v1440_v17  ;;  %v485_v33 = vpop.f32.mrb[19].mxu1 }
 0x192   : > { %702 = vst [vmem:[%s1447_s22 + $0x88] sm:$0xff] %v641_v29  ;;  %v486_v35 = vadd.f32 %v485_v33, %v1442_v19 }
 0x193   : > { %v645_v36 = vadd.f32 %v644_v53, %v484_v32 }
 0x194   : > { %v647_v37 = vadd.f32 %v646_v56, %v486_v35  ;;  %v489_v38 = vpop.f32.mrb[20].mxu1 }
 0x195   : > { %703 = vst [vmem:[%s1447_s22 + $0x90] sm:$0xff] %v645_v36  ;;  %v490_v40 = vadd.f32 %v489_v38, %v1440_v17  ;;  %v491_v41 = vpop.f32.mrb[21].mxu1 }
 0x196   : > { %704 = vst [vmem:[%s1447_s22 + $0x98] sm:$0xff] %v647_v37  ;;  %v492_v43 = vadd.f32 %v491_v41, %v1442_v19 }
 0x197   : > { %v651_v44 = vadd.f32 %v650_v61, %v490_v40 }
 0x198   : > { %v653_v45 = vadd.f32 %v652_v0, %v492_v43  ;;  %v495_v46 = vpop.f32.mrb[22].mxu1 }
 0x199   : > { %705 = vst [vmem:[%s1447_s22 + $0xa0] sm:$0xff] %v651_v44  ;;  %v496_v47 = vadd.f32 %v495_v46, %v1440_v17  ;;  %v497_v48 = vpop.f32.mrb[23].mxu1 }
 0x19a   : > { %706 = vst [vmem:[%s1447_s22 + $0xa8] sm:$0xff] %v653_v45  ;;  %v498_v49 = vadd.f32 %v497_v48, %v1442_v19 }
 0x19b   : > { %v657_v50 = vadd.f32 %v656_v5, %v496_v47 }
 0x19c   : > { %v659_v51 = vadd.f32 %v658_v8, %v498_v49  ;;  %v501_v52 = vpop.f32.mrb[24].mxu1 }
 0x19d   : > { %707 = vst [vmem:[%s1447_s22 + $0xb0] sm:$0xff] %v657_v50  ;;  %v502_v53 = vadd.f32 %v501_v52, %v1440_v17  ;;  %v503_v54 = vpop.f32.mrb[25].mxu1 }
 0x19e   : > { %708 = vst [vmem:[%s1447_s22 + $0xb8] sm:$0xff] %v659_v51  ;;  %v504_v55 = vadd.f32 %v503_v54, %v1442_v19 }
 0x19f   : > { %v663_v56 = vadd.f32 %v662_v13, %v502_v53 }
 0x1a0   : > { %v665_v57 = vadd.f32 %v664_v16, %v504_v55  ;;  %v507_v58 = vpop.f32.mrb[26].mxu1 }
 0x1a1   : > { %709 = vst [vmem:[%s1447_s22 + $0xc0] sm:$0xff] %v663_v56  ;;  %v508_v59 = vadd.f32 %v507_v58, %v1440_v17  ;;  %v509_v60 = vpop.f32.mrb[27].mxu1 }
 0x1a2   : > { %710 = vst [vmem:[%s1447_s22 + $0xc8] sm:$0xff] %v665_v57  ;;  %v510_v61 = vadd.f32 %v509_v60, %v1442_v19 }
 0x1a3   : > { %v669_v62 = vadd.f32 %v668_v23, %v508_v59 }
 0x1a4   : > { %v671_v63 = vadd.f32 %v670_v26, %v510_v61  ;;  %v513_v0 = vpop.f32.mrb[28].mxu1 }
 0x1a5   : > { %711 = vst [vmem:[%s1447_s22 + $0xd0] sm:$0xff] %v669_v62  ;;  %v514_v1 = vadd.f32 %v513_v0, %v1440_v17  ;;  %v515_v2 = vpop.f32.mrb[29].mxu1 }
 0x1a6   : > { %712 = vst [vmem:[%s1447_s22 + $0xd8] sm:$0xff] %v671_v63  ;;  %v516_v3 = vadd.f32 %v515_v2, %v1442_v19 }
 0x1a7   : > { %v675_v4 = vadd.f32 %v674_v31, %v514_v1 }
 0x1a8   : > { %v677_v5 = vadd.f32 %v676_v34, %v516_v3  ;;  %v519_v6 = vpop.f32.mrb[30].mxu1 }
 0x1a9   : > { %713 = vst [vmem:[%s1447_s22 + $0xe0] sm:$0xff] %v675_v4  ;;  %v520_v7 = vadd.f32 %v519_v6, %v1440_v17  ;;  %v521_v8 = vpop.f32.mrb[31].mxu1 }
 0x1aa   : > { %714 = vst [vmem:[%s1447_s22 + $0xe8] sm:$0xff] %v677_v5  ;;  %v522_v9 = vadd.f32 %v521_v8, %v1442_v19 }
 0x1ab   : > { %v681_v10 = vadd.f32 %v680_v39, %v520_v7 }
 0x1ac   : > { %v683_v11 = vadd.f32 %v682_v42, %v522_v9 }
 0x1ad   : > { %715 = vst [vmem:[%s1447_s22 + $0xf0] sm:$0xff] %v681_v10 }
 0x1ae   : > { %716 = vst [vmem:[%s1447_s22 + $0xf8] sm:$0xff] %v683_v11 }
 0x1af   : > { %1131 = shalt.err (!%p1128_p7)
}
 0x1b0   : > { %s1132_s25 = scalar_lea.hbm %s1514_s27, 4096  ;;  %s1136_s9 = scalar_lea.hbm %s1565_s3, 8192 }
 0x1b1   : > { %p1133_p9 = scmp.ne.s32.totalorder %s1514_s27, %s1132_s25  ;;  %p1137_p5 = scmp.lt.u32.totalorder %s1514_s27, %s1565_s3 }
 0x1b2   : > { %p1138_p11 = scmp.lt.u32.totalorder %s1136_s9, %s1132_s25  ;;  %p1140_p4 = scmp.lt.u32.totalorder %s1132_s25, %s1514_s27 }
 0x1b3   : > { %p1134_p2 = pnand %p1133_p9, %p1311_p12 }
 0x1b4   : > { %p1139_p1 = por %p1138_p11, %p1137_p5 }
 0x1b5   : > { %p1135_p0 = pneg %p1134_p2 }
 0x1b6   : > { %p1141_p6 = por %p1140_p4, %p1139_p1 }
 0x1b8   : > { %p1142_p8 = pnand %p1141_p6, %p1135_p0 }
 0x1ba   : > { %1145 = shalt.err (!%p1142_p8)
}
 0x1bb   : > { %s1198_s4 = smov 256   ;;  %s1199_s22 = smov 16  }
 0x1bc   : > { %1002 = dma.vmem_to_hbm [thread:$0]  (%p1311_p12), %s1516_s5, 4096, %s1514_s27, %s718_s16, %s1198_s4, %s1198_s4, %s1199_s22  }
 0x1bd PF: > { %s747_s26 = sand.u32 1, %s1176_s12   ;;  %p1580_p10 = scmp.ne.s32.totalorder %s1570_s19, 0 }
 0x1be   : > { %p1581_p13 = scmp.ge.s32.totalorder %s1188_s15, 2  ;;  %s748_s10 = scalar_lea.sflag [#allocation4], %s747_s26 }
 0x1c0   : > { %p1013_p3 = pnand %p1581_p13, %p1580_p10 }
 0x1c2   : > { %1171 = dma.done.wait (!%p1013_p3), %s748_s10, 4096  }
 0x1c3   : > { %1173 = vsyncadd (!%p1013_p3), %s748_s10, 4294963200  ;;  %p17_p7 = scmp.ge.s32.totalorder %s1276_s24, 4   ;;  %s1582_s12 = smov %s1180_s13 }
 0x1c4   : > { %s1583_s13 = smov %s1184_s14  ;;  %s1584_s14 = smov %s1307_s17 }
 0x1c5   : > { %s1585_s15 = smov %s1276_s24  ;;  %19 = sbr.rel (!%p17_p7) target bundleno = 6 (0x6), region = 81 }
 0x1cc   :  { %753 = vsyncpa [#allocation3], 1 }
 0x1cd   :  { %755 = vsyncpa [#allocation3 + $0x1], 1 }
 0x1ce   :  { %756 = vsyncpa [#allocation6], 1 }
 0x1cf   :  { %757 = vsyncpa [#allocation4], 1 }
 0x1d0   :  { %759 = vsyncpa [#allocation4 + $0x1], 1 }

</bundles_post_ra>
